<compile_context>
chip_gen: v6e
topology: v6e:2x2x1
jax: 0.10.0
libtpu: 0.0.40
codegen_flags: <defaults>
</compile_context>

<pallas_src>
import functools

import jax
import jax.numpy as jnp
from jax.experimental import pallas as pl
from jax.experimental.pallas import tpu as pltpu

LANES = 128
MAX_TILE_R = 2048      # rows per grid step: 2 inputs x 2 bufs x 1 MiB (f32) = 4 MiB VMEM
NUM_CORE_SPLITS = 2    # leading "parallel" grid axis -> both TensorCores on v7x


def _loss_partials_kernel(x_ref, t_ref, out_ref, *, focal_alpha, gamma,
                          n_valid, tile_r, blocks_per_core):
    """Accumulate per-lane partial sums into an (8, 128) slab per core-split.

    Rows of out_ref: 0 = sum(focal), 1 = sum(p*t), 2 = sum(p), 3 = sum(t),
    rows 4..7 are zero padding (so the store is a full unmasked (8,128) tile).
    """
    c = pl.program_id(0)   # core-split axis ("parallel")
    i = pl.program_id(1)   # reduction axis ("arbitrary")

    @pl.when(i == 0)
    def _():
        out_ref[...] = jnp.zeros_like(out_ref)

    x = x_ref[...].astype(jnp.float32)   # logits
    t = t_ref[...].astype(jnp.float32)   # binary targets

    p = jax.nn.sigmoid(x)

    # F.binary_cross_entropy_with_logits applied to the *sigmoided* value p
    # (the PyTorch module's double-sigmoid quirk).  Since p in (0,1):
    # max(p,0) == p and |p| == p, so the stable form simplifies exactly to:
    bce = p - p * t + jnp.log1p(jnp.exp(-p))
    pt = jnp.exp(-bce)
    w = 1.0 - pt
    if gamma == 2.0:         # default: avoid pow -> exp(gamma*log(.)) on EUP
        fw = w * w
    elif gamma == 1.0:
        fw = w
    elif gamma == 0.0:
        fw = jnp.ones_like(w)
    else:
        fw = w ** gamma
    focal = focal_alpha * fw * bce

    # Tail / duplicated-block mask built in-kernel from the global element
    # index (cheap VALU filler on a memory-bound kernel; no mask array in HBM).
    block_idx = c * blocks_per_core + i
    base = block_idx * (tile_r * LANES)
    row = jax.lax.broadcasted_iota(jnp.int32, (tile_r, LANES), 0)
    lane = jax.lax.broadcasted_iota(jnp.int32, (tile_r, LANES), 1)
    valid = (base + row * LANES + lane) < n_valid

    focal_m = jnp.where(valid, focal, 0.0)
    p_m = jnp.where(valid, p, 0.0)
    t_m = jnp.where(valid, t, 0.0)

    partial = jnp.concatenate(
        [
            jnp.sum(focal_m, axis=0, keepdims=True),
            jnp.sum(p_m * t_m, axis=0, keepdims=True),
            jnp.sum(p_m, axis=0, keepdims=True),
            jnp.sum(t_m, axis=0, keepdims=True),
            jnp.zeros((4, LANES), jnp.float32),
        ],
        axis=0,
    )
    out_ref[...] += partial   # single unmasked (8,128) store per grid step


def _partial_sums(logits_flat, targets_flat, *, focal_alpha, gamma):
    """Run the Pallas kernel on flattened logits/targets.

    Returns (focal_sum, intersection, pred_sum, target_sum) as f32 scalars.
    """
    n = logits_flat.shape[0]

    x = logits_flat
    t = targets_flat
    if t.dtype == jnp.bool_:
        t = t.astype(jnp.float32)

    # Pad only when n is not already a whole number of (8,128) tiles (typical
    # segmentation shapes need no pad -> no extra HBM copy).  Padded zeros are
    # masked out in-kernel via the element-index mask.
    pad = (-n) % (8 * LANES)
    if pad:
        x = jnp.pad(x, (0, pad))
        t = jnp.pad(t, (0, pad))

    rows = (n + pad) // LANES                 # multiple of 8
    x = x.reshape(rows, LANES)
    t = t.reshape(rows, LANES)

    tile_r = min(MAX_TILE_R, rows)            # multiple of 8, <= rows
    nblocks = pl.cdiv(rows, tile_r)
    bpc = pl.cdiv(nblocks, NUM_CORE_SPLITS)   # row-blocks per core-split

    def in_map(c, i):
        # Clamp so the DMA never starts past the end of the array; duplicated
        # blocks contribute nothing thanks to the in-kernel index mask.
        return (jnp.minimum(c * bpc + i, nblocks - 1), 0)

    in_spec = pl.BlockSpec((tile_r, LANES), in_map)

    kernel = functools.partial(
        _loss_partials_kernel,
        focal_alpha=float(focal_alpha),
        gamma=float(gamma),
        n_valid=n,
        tile_r=tile_r,
        blocks_per_core=bpc,
    )

    partials = pl.pallas_call(
        kernel,
        out_shape=jax.ShapeDtypeStruct((NUM_CORE_SPLITS, 8, LANES), jnp.float32),
        grid_spec=pltpu.PrefetchScalarGridSpec(
            num_scalar_prefetch=0,
            grid=(NUM_CORE_SPLITS, bpc),
            in_specs=[in_spec, in_spec],
            out_specs=pl.BlockSpec((None, 8, LANES), lambda c, i: (c, 0, 0)),
        ),
        compiler_params=pltpu.CompilerParams(
            dimension_semantics=("parallel", "arbitrary"),
        ),
    )(x, t)

    sums = jnp.sum(partials, axis=(0, 2))     # reduce core-splits + 128 lanes (glue)
    return sums[0], sums[1], sums[2], sums[3]


def focal_dice_loss(
    predictions,
    targets,
    *,
    alpha=0.5,
    gamma=2.0,
    focal_alpha=0.25,
    smooth=1e-5,
):
    """JAX/Pallas equivalent of FocalDiceLoss.forward.

    `predictions` may be a single logits array or a list/tuple of logits
    arrays (each with the same shape as `targets`), matching PyTorch.
    """
    preds = predictions if isinstance(predictions, (list, tuple)) else [predictions]

    t_flat = targets.reshape(-1)
    focal_losses = []
    dice_losses = []
    # Note: for len(preds) > 1 the predictions could be stacked and fused into
    # a single pallas_call (targets DMA'd once per tile); kept per-pred here.
    for pred in preds:
        p_flat = pred.reshape(-1)
        n = p_flat.shape[0]
        focal_sum, inter, p_sum, t_sum = _partial_sums(
            p_flat, t_flat, focal_alpha=focal_alpha, gamma=gamma
        )
        focal_losses.append(focal_sum / n)
        dice_score = (2.0 * inter + smooth) / (p_sum + t_sum + smooth)
        dice_losses.append(1.0 - dice_score)

    focal_loss = sum(focal_losses) / len(focal_losses)
    dice_loss = sum(dice_losses) / len(dice_losses)
    return alpha * focal_loss + (1.0 - alpha) * dice_loss


def _reference_focal_dice_loss(
    predictions, targets, *, alpha=0.5, gamma=2.0, focal_alpha=0.25, smooth=1e-5
):
    """Pure-JAX reference mirroring the PyTorch module (incl. double sigmoid)."""
    x = predictions.reshape(-1).astype(jnp.float32)
    t = targets.reshape(-1).astype(jnp.float32)
    p = jax.nn.sigmoid(x)
    bce = jnp.maximum(p, 0.0) - p * t + jnp.log1p(jnp.exp(-jnp.abs(p)))
    pt = jnp.exp(-bce)
    focal = jnp.mean(focal_alpha * (1.0 - pt) ** gamma * bce)
    inter = jnp.sum(p * t)
    union = jnp.sum(p) + jnp.sum(t)
    dice = 1.0 - (2.0 * inter + smooth) / (union + smooth)
    return alpha * focal + (1.0 - alpha) * dice


if __name__ == "__main__":
    key = jax.random.PRNGKey(0)
    k1, k2, k3, k4 = jax.random.split(key, 4)

    # Small NCHW example consistent with a segmentation head.
    B, C, H, W = 2, 4, 16, 16
    predictions = jax.random.normal(k1, (B, C, H, W), dtype=jnp.float32)
    targets = (jax.random.uniform(k2, (B, C, H, W)) > 0.5).astype(jnp.float32)

    loss = jax.block_until_ready(focal_dice_loss(predictions, targets))
    ref = jax.block_until_ready(_reference_focal_dice_loss(predictions, targets))
    assert jnp.isfinite(loss), "loss is not finite"
    assert jnp.allclose(loss, ref, rtol=1e-4, atol=1e-5), (loss, ref)

    # Ragged-tail case (n not a multiple of 8*128) exercises the in-kernel mask.
    shp = (2, 3, 10, 9)
    pred_odd = jax.random.normal(k3, shp, dtype=jnp.float32)
    tgt_odd = (jax.random.uniform(k4, shp) > 0.5).astype(jnp.float32)
    loss_odd = jax.block_until_ready(focal_dice_loss(pred_odd, tgt_odd))
    ref_odd = jax.block_until_ready(_reference_focal_dice_loss(pred_odd, tgt_odd))
    assert jnp.allclose(loss_odd, ref_odd, rtol=1e-4, atol=1e-5), (loss_odd, ref_odd)

    # List-of-predictions path (matches the PyTorch module's list handling).
    preds_list = [predictions, predictions * 0.5]
    loss_list = jax.block_until_ready(focal_dice_loss(preds_list, targets))
    ref_list = 0.5 * (
        _reference_focal_dice_loss(preds_list[0], targets)
        + _reference_focal_dice_loss(preds_list[1], targets)
    )
    assert jnp.allclose(loss_list, ref_list, rtol=1e-4, atol=1e-5), (loss_list, ref_list)

    print("KERNEL_OK")
</pallas_src>

<mosaic_0001>
module attributes {stable_mosaic.version = 11 : i64} {
  func.func @_loss_partials_kernel(%arg0: i32, %arg1: i32, %arg2: memref<16x128xf32, #tpu.memory_space<vmem>>, %arg3: memref<16x128xf32, #tpu.memory_space<vmem>>, %arg4: memref<1x8x128xf32, #tpu.memory_space<vmem>>) attributes {dimension_semantics = [#tpu.dimension_semantics<parallel>, #tpu.dimension_semantics<arbitrary>], iteration_bounds = array<i64: 2, 1>, scalar_prefetch = 0 : i64, scratch_operands = 0 : i64, tpu.core_type = #tpu.core_type<tc>, window_params = [{transform_indices = @transform_0, window_bounds = array<i64: 16, 128>}, {transform_indices = @transform_1, window_bounds = array<i64: 16, 128>}, {transform_indices = @transform_2, window_bounds = array<i64: 1, 8, 128>}]} {
    %c0_i32 = arith.constant 0 : i32
    %0 = arith.cmpi eq, %arg1, %c0_i32 : i32
    %1 = arith.extui %0 : i1 to i32
    %c0_i32_0 = arith.constant 0 : i32
    %2 = arith.cmpi ne, %1, %c0_i32_0 : i32
    scf.if %2 {
      %cst_23 = arith.constant 0.000000e+00 : f32
      %61 = vector.broadcast %cst_23 : f32 to vector<8x128xf32>
      %c0_24 = arith.constant 0 : index
      %c0_25 = arith.constant 0 : index
      %c0_26 = arith.constant 0 : index
      %62 = vector.load %arg4[%c0_24, %c0_25, %c0_26] : memref<1x8x128xf32, #tpu.memory_space<vmem>>, vector<1x8x128xf32>
      %63 = vector.shape_cast %62 : vector<1x8x128xf32> to vector<8x128xf32>
      %64 = vector.shape_cast %61 : vector<8x128xf32> to vector<1x8x128xf32>
      tpu.vector_store %arg4[%c0_24, %c0_25, %c0_26], %64 {strides = array<i32>} : memref<1x8x128xf32, #tpu.memory_space<vmem>>, vector<1x8x128xf32>,
    } else {
    }
    %c0 = arith.constant 0 : index
    %c0_1 = arith.constant 0 : index
    %3 = vector.load %arg2[%c0, %c0_1] : memref<16x128xf32, #tpu.memory_space<vmem>>, vector<16x128xf32>
    %c0_2 = arith.constant 0 : index
    %c0_3 = arith.constant 0 : index
    %4 = vector.load %arg3[%c0_2, %c0_3] : memref<16x128xf32, #tpu.memory_space<vmem>>, vector<16x128xf32>
    %5 = arith.negf %3 : vector<16x128xf32>
    %6 = math.exp %5 : vector<16x128xf32>
    %cst = arith.constant 1.000000e+00 : f32
    %7 = vector.broadcast %cst : f32 to vector<16x128xf32>
    %8 = arith.addf %7, %6 : vector<16x128xf32>
    %9 = arith.divf %7, %8 : vector<16x128xf32>
    %10 = arith.mulf %9, %4 : vector<16x128xf32>
    %11 = arith.subf %9, %10 : vector<16x128xf32>
    %cst_4 = arith.constant 0.000000e+00 : f32
    %12 = vector.broadcast %cst_4 : f32 to vector<16x128xf32>
    %13 = arith.subf %12, %9 : vector<16x128xf32>
    %14 = math.exp %13 : vector<16x128xf32>
    %15 = math.log1p %14 : vector<16x128xf32>
    %16 = arith.addf %11, %15 : vector<16x128xf32>
    %cst_5 = arith.constant 0.000000e+00 : f32
    %17 = vector.broadcast %cst_5 : f32 to vector<16x128xf32>
    %18 = arith.subf %17, %16 : vector<16x128xf32>
    %19 = math.exp %18 : vector<16x128xf32>
    %cst_6 = arith.constant 1.000000e+00 : f32
    %20 = vector.broadcast %cst_6 : f32 to vector<16x128xf32>
    %21 = arith.subf %20, %19 : vector<16x128xf32>
    %22 = arith.mulf %21, %21 : vector<16x128xf32>
    %cst_7 = arith.constant 2.500000e-01 : f32
    %23 = vector.broadcast %cst_7 : f32 to vector<16x128xf32>
    %24 = arith.mulf %23, %22 : vector<16x128xf32>
    %25 = arith.mulf %24, %16 : vector<16x128xf32>
    %c1_i32 = arith.constant 1 : i32
    %26 = arith.muli %arg0, %c1_i32 : i32
    %27 = arith.addi %26, %arg1 : i32
    %c2048_i32 = arith.constant 2048 : i32
    %28 = arith.muli %27, %c2048_i32 : i32
    %29 = tpu.iota {dimensions = array<i32: 0>} : vector<16x128xi32>
    %30 = tpu.iota {dimensions = array<i32: 1>} : vector<16x128xi32>
    %c128_i32 = arith.constant 128 : i32
    %31 = vector.broadcast %c128_i32 : i32 to vector<16x128xi32>
    %32 = arith.muli %29, %31 : vector<16x128xi32>
    %33 = vector.broadcast %28 : i32 to vector<16x128xi32>
    %34 = arith.addi %33, %32 : vector<16x128xi32>
    %35 = arith.addi %34, %30 : vector<16x128xi32>
    %c2048_i32_8 = arith.constant 2048 : i32
    %36 = vector.broadcast %c2048_i32_8 : i32 to vector<16x128xi32>
    %37 = arith.cmpi slt, %35, %36 : vector<16x128xi32>
    %cst_9 = arith.constant 0.000000e+00 : f32
    %38 = vector.broadcast %cst_9 : f32 to vector<16x128xf32>
    %39 = arith.select %37, %25, %38 : vector<16x128xi1>, vector<16x128xf32>
    %cst_10 = arith.constant 0.000000e+00 : f32
    %40 = vector.broadcast %cst_10 : f32 to vector<16x128xf32>
    %41 = arith.select %37, %9, %40 : vector<16x128xi1>, vector<16x128xf32>
    %cst_11 = arith.constant 0.000000e+00 : f32
    %42 = vector.broadcast %cst_11 : f32 to vector<16x128xf32>
    %43 = arith.select %37, %4, %42 : vector<16x128xi1>, vector<16x128xf32>
    %cst_12 = arith.constant dense<0.000000e+00> : vector<128xf32>
    %44 = vector.multi_reduction <add>, %39, %cst_12 [0] : vector<16x128xf32> to vector<128xf32>
    %45 = vector.shape_cast %44 : vector<128xf32> to vector<1x128xf32>
    %46 = arith.mulf %41, %43 : vector<16x128xf32>
    %cst_13 = arith.constant dense<0.000000e+00> : vector<128xf32>
    %47 = vector.multi_reduction <add>, %46, %cst_13 [0] : vector<16x128xf32> to vector<128xf32>
    %48 = vector.shape_cast %47 : vector<128xf32> to vector<1x128xf32>
    %cst_14 = arith.constant dense<0.000000e+00> : vector<128xf32>
    %49 = vector.multi_reduction <add>, %41, %cst_14 [0] : vector<16x128xf32> to vector<128xf32>
    %50 = vector.shape_cast %49 : vector<128xf32> to vector<1x128xf32>
    %cst_15 = arith.constant dense<0.000000e+00> : vector<128xf32>
    %51 = vector.multi_reduction <add>, %43, %cst_15 [0] : vector<16x128xf32> to vector<128xf32>
    %52 = vector.shape_cast %51 : vector<128xf32> to vector<1x128xf32>
    %cst_16 = arith.constant 0.000000e+00 : f32
    %53 = vector.broadcast %cst_16 : f32 to vector<4x128xf32>
    %54 = tpu.concatenate %45, %48, %50, %52, %53 in 0 : vector<1x128xf32>, vector<1x128xf32>, vector<1x128xf32>, vector<1x128xf32>, vector<4x128xf32> -> vector<8x128xf32>
    %c0_17 = arith.constant 0 : index
    %c0_18 = arith.constant 0 : index
    %c0_19 = arith.constant 0 : index
    %55 = vector.load %arg4[%c0_17, %c0_18, %c0_19] : memref<1x8x128xf32, #tpu.memory_space<vmem>>, vector<1x8x128xf32>
    %56 = vector.shape_cast %55 : vector<1x8x128xf32> to vector<8x128xf32>
    %57 = arith.addf %56, %54 : vector<8x128xf32>
    %c0_20 = arith.constant 0 : index
    %c0_21 = arith.constant 0 : index
    %c0_22 = arith.constant 0 : index
    %58 = vector.load %arg4[%c0_20, %c0_21, %c0_22] : memref<1x8x128xf32, #tpu.memory_space<vmem>>, vector<1x8x128xf32>
    %59 = vector.shape_cast %58 : vector<1x8x128xf32> to vector<8x128xf32>
    %60 = vector.shape_cast %57 : vector<8x128xf32> to vector<1x8x128xf32>
    tpu.vector_store %arg4[%c0_20, %c0_21, %c0_22], %60 {strides = array<i32>} : memref<1x8x128xf32, #tpu.memory_space<vmem>>, vector<1x8x128xf32>,
    return
  }
  func.func @transform_0(%arg0: i32, %arg1: i32) -> (i32, i32) {
    %c1_i32 = arith.constant 1 : i32
    %0 = arith.muli %arg0, %c1_i32 : i32
    %1 = arith.addi %0, %arg1 : i32
    %c0_i32 = arith.constant 0 : i32
    %2 = arith.minsi %1, %c0_i32 : i32
    %c0_i32_0 = arith.constant 0 : i32
    %c0_i32_1 = arith.constant 0 : i32
    return %2, %c0_i32_0 : i32, i32
  }
  func.func @transform_1(%arg0: i32, %arg1: i32) -> (i32, i32) {
    %c1_i32 = arith.constant 1 : i32
    %0 = arith.muli %arg0, %c1_i32 : i32
    %1 = arith.addi %0, %arg1 : i32
    %c0_i32 = arith.constant 0 : i32
    %2 = arith.minsi %1, %c0_i32 : i32
    %c0_i32_0 = arith.constant 0 : i32
    %c0_i32_1 = arith.constant 0 : i32
    return %2, %c0_i32_0 : i32, i32
  }
  func.func @transform_2(%arg0: i32, %arg1: i32) -> (i32, i32, i32) {
    %c0_i32 = arith.constant 0 : i32
    %c0_i32_0 = arith.constant 0 : i32
    %c0_i32_1 = arith.constant 0 : i32
    return %arg0, %c0_i32, %c0_i32_0 : i32, i32, i32
  }
}

</mosaic_0001>

<bundles_post_ra>
// kernel: tpu_custom_call.1
= control target key start
LH: loop header
LB: loop body
LE: loop exit
PB: predicated region body
PF: predicated region fallthrough
CT: control target
= control target key end

     0   :  { %7 = vsyncpa [#allocation3], 0  ;;  %s1000_s0 = inlined_call_operand.hbm [shape: f32[16,128], index: 0, kind: input, shape index: {}]   ;;  %s1001_s1 = inlined_call_operand.hbm [shape: f32[16,128], index: 1, kind: input, shape index: {}]   ;;  %s1002_s2 = inlined_call_operand.hbm [shape: f32[2,8,128], index: 2, kind: output, shape index: {}]  }
   0x1   :  { %9 = vsyncpa [#allocation3 + $0x1], 0 }
   0x2   :  { %10 = vsyncpa [#allocation6], 0 }
   0x3   :  { %12 = vsyncpa [#allocation6 + $0x1], 0 }
   0x4   :  { %13 = vsyncpa [#allocation4], 0 }
   0x5   :  { %15 = vsyncpa [#allocation4 + $0x1], 0  ;;  %s803_s9 = smov 0   ;;  %s805_s10 = smov 0  }
   0x6   :  { %s807_s11 = smov 0   ;;  %s809_s12 = smov 0  }
   0x7   :  { %s811_s13 = smov 0   ;;  %s813_s14 = smov 0  }
   0x8   :  { %s815_s15 = smov 0   ;;  %s817_s16 = smov 0  }
   0x9 LB: > { %s483_s17 = sadd.s32 4294967295, %s781_s16   ;;  %s484_s18 = sadd.s32 4294967294, %s781_s16   ;;  %s781_s16 = sphi %s817_s16, %s21_s16   ;;  %s777_s15 = sphi %s815_s15, %s1021_s15   ;;  %s773_s14 = sphi %s813_s14, %s1020_s14   ;;  %s769_s13 = sphi %s811_s13, %s990_s13   ;;  %s765_s12 = sphi %s809_s12, %s1019_s12   ;;  %s761_s11 = sphi %s807_s11, %s1018_s11   ;;  %s757_s10 = sphi %s805_s10, %s1017_s10   ;;  %s753_s9 = sphi %s803_s9, %s1016_s9  }
   0xa   : > { %s33_s19 = sadd.s32 1, %s777_s15  ;;  %p750_p1 = scmp.ne.s32.totalorder %s769_s13, 0 }
   0xb   : > { %p35_p0 = scmp.ge.s32.totalorder %s33_s19, 2  ;;  %p54_p2 = scmp.eq.s32.totalorder %s781_s16, 0 }
   0xc   : > { %p59_p3 = scmp.ne.s32.totalorder %s769_s13, %s765_s12  ;;  %p60_p5 = scmp.eq.s32.totalorder %s483_s17, 0 }
   0xd   : > { %s1023_s19 = smov (%p35_p0, %s33_s19), 0  ;;  %p849_p4 = por %p750_p1, %p54_p2 }
   0xe   : > { %p853_p6 = por %p60_p5, %p59_p3  ;;  %s101_s22 = ssub.s32 %s777_s15, %s1023_s19 }
   0xf   : > { %p102_p7 = scmp.eq.s32.totalorder %s101_s22, 0  ;;  %s104_s23 = sadd.s32 1, %s761_s11 }
  0x10   : > { %s1006_s21 = scalar_select %p853_p6, 1, 0 }
  0x11   : > { %s861_s24 = scalar_select %p102_p7, %s761_s11, %s104_s23  }
  0x12   : > { %p114_p8 = scmp.ne.s32.totalorder %s761_s11, %s757_s10  ;;  %p115_p9 = scmp.eq.s32.totalorder %s483_s17, 1 }
  0x13   : > { %p120_p10 = scmp.ne.s32.totalorder %s757_s10, %s753_s9  ;;  %p121_p11 = scmp.eq.s32.totalorder %s484_s18, 1 }
  0x14   : > { %p867_p12 = por %p115_p9, %p114_p8  ;;  %p523_p1 = scmp.lt.s32.totalorder %s781_s16, 2 }
  0x15   : > { %p872_p0 = por %p121_p11, %p120_p10  ;;  %s783_s27 = smov [#allocation2]  }
  0x16   : > { %s1007_s25 = scalar_select %p867_p12, 1, 0 }
  0x17   : > { %s1008_s26 = scalar_select %p872_p0, 1, 0 }
  0x18   : > { %s155_s28 = sshll.u32 %s783_s27, 4  ;;  %p879_p2 = pnand %p523_p1, %p849_p4  ;;  %s156_s28 = int_to_ptr.vmem [resolvable:$true] %s155_s28 }
  0x19   : > { %s620_s4 = scalar_lea.hbm %s1000_s0, 256 }
  0x1a   : > { %p621_p3 = scmp.ne.s32.totalorder %s1000_s0, %s620_s4  ;;  %p622_p5 = pneg %p879_p2 }
  0x1b   : > { %p627_p8 = scmp.lt.s32.totalorder %s620_s4, %s620_s4 }
  0x1c   : > { %p623_p7 = pnand %p622_p5, %p621_p3 }
  0x1e   : > { %p624_p4 = pneg %p623_p7 }
  0x20   : > { %p629_p9 = pnand %p627_p8, %p624_p4 }
  0x22   : > { %632 = shalt.err (!%p629_p9)
}
  0x23   : > { %s633_s7 = scalar_lea.vmem %s156_s28, 256  ;;  %s640_s8 = scalar_lea.vmem %s156_s28, 512 }
  0x24   : > { %p634_p10 = scmp.ne.s32.totalorder %s156_s28, %s633_s7  ;;  %p641_p13 = scmp.lt.s32.totalorder %s156_s28, %s156_s28 }
  0x25   : > { %p642_p0 = scmp.lt.s32.totalorder %s640_s8, %s633_s7 }
  0x26   : > { %p636_p11 = pnand %p634_p10, %p622_p5 }
  0x27   : > { %p643_p12 = por %p642_p0, %p641_p13 }
  0x28   : > { %p637_p1 = pneg %p636_p11 }
  0x2a   : > { %p644_p6 = pnand %p643_p12, %p637_p1 }
  0x2c   : > { %647 = shalt.err (!%p644_p6)
}
  0x2d   : > { %s784_s12 = smov 128   ;;  %s785_s17 = smov 8  }
  0x2e   : > { %515 = dma.hbm_to_vmem [thread:$0]  (!%p879_p2), %s1000_s0, 256, %s156_s28, [#allocation3], %s784_s12, %s784_s12, %s785_s17  }
  0x2f   : > { %p493_p3 = scmp.ge.s32.totalorder %s781_s16, 1  ;;  %p187_p7 = scmp.lt.s32.totalorder %s781_s16, 3 }
  0x30   : > { %s786_s23 = smov [#allocation5]   ;;  %s648_s4 = scalar_lea.hbm %s1001_s1, 256 }
  0x31   : > { %p904_p4 = pnand %p493_p3, %p187_p7  ;;  %s179_s27 = sshll.u32 %s786_s23, 4  ;;  %s180_s27 = int_to_ptr.vmem [resolvable:$true] %s179_s27 }
  0x32   : > { %p649_p6 = scmp.ne.s32.totalorder %s1001_s1, %s648_s4  ;;  %p655_p0 = scmp.lt.s32.totalorder %s648_s4, %s648_s4 }
  0x33   : > { %s1010_s22 = scalar_select %p904_p4, 1, 0 }
  0x34   : > { %p651_p12 = pnand %p649_p6, %p622_p5 }
  0x36   : > { %p652_p13 = pneg %p651_p12 }
  0x38   : > { %p657_p8 = pnand %p655_p0, %p652_p13 }
  0x3a   : > { %660 = shalt.err (!%p657_p8)
}
  0x3b   : > { %s661_s28 = scalar_lea.vmem %s180_s27, 256  ;;  %s668_s7 = scalar_lea.vmem %s180_s27, 512 }
  0x3c   : > { %p662_p9 = scmp.ne.s32.totalorder %s180_s27, %s661_s28  ;;  %p669_p1 = scmp.lt.s32.totalorder %s180_s27, %s180_s27 }
  0x3d   : > { %p670_p3 = scmp.lt.s32.totalorder %s668_s7, %s661_s28 }
  0x3e   : > { %p664_p10 = pnand %p662_p9, %p622_p5 }
  0x3f   : > { %p671_p7 = por %p670_p3, %p669_p1 }
  0x40   : > { %p665_p11 = pneg %p664_p10 }
  0x42   : > { %p672_p4 = pnand %p671_p7, %p665_p11 }
  0x44   : > { %675 = shalt.err (!%p672_p4)
}
  0x45   : > { %518 = dma.hbm_to_vmem [thread:$0]  (!%p879_p2), %s1001_s1, 256, %s180_s27, [#allocation6], %s784_s12, %s784_s12, %s785_s17  }
  0x46   : > { %p1011_p6 = scmp.ne.s32.totalorder %s1010_s22, 0 }
  0x47   : > { %s193_s20 = sand.u32 (!%p1011_p6), 1, %s769_s13   ;;  %p1012_p5 = scmp.ne.s32.totalorder (!%p1011_p6), %s1006_s21, 0 }
  0x48   : > { %191 = sbr.rel (%p1011_p6) target bundleno = 211 (0xd3), region = 28  ;;  %s494_s23 = sshll.u32 (!%p1011_p6), %s193_s20, 4 }
  0x49   : > { %s194_s30 = scalar_lea.sflag (!%p1011_p6), [#allocation3], %s193_s20  ;;  %s197_s3 = scalar_lea.vmem (!%p1011_p6), [#allocation2], %s494_s23 }
  0x4d   : > { %739 = dma.done.wait (%p1012_p5), %s194_s30, 256  }
  0x4e   : > { %741 = vsyncadd (%p1012_p5), %s194_s30, 4294967040  ;;  %s203_s29 = scalar_lea.sflag [#allocation6], %s193_s20  ;;  %s206_s4 = scalar_lea.vmem [#allocation5], %s494_s23 }
  0x4f   : > { %743 = dma.done.wait (%p1012_p5), %s203_s29, 256  }
  0x50   : > { %745 = vsyncadd (%p1012_p5), %s203_s29, 4294967040  ;;  %v245_v0 = vld [vmem:[%s197_s3] sm:$0xff]  ;;  %v246_v1 = vld [vmem:[%s197_s3 + $0x8] sm:$0xff]  ;;  %v307_v4 = vlaneseq  ;;  %s499_s12 = sshll.u32 %s773_s14, 11  ;;  %s229_s21 = sand.u32 1, %s757_s10   ;;  %vm357_vm4 = vcmask 1040384  }
  0x51   : > { %v497_v2 = vmul.f32 -1.442695, %v245_v0  ;;  %v498_v3 = vmul.f32 -1.442695, %v246_v1  ;;  %v314_v12 = vstv %s499_s12  ;;  %v247_v19 = vld [vmem:[%s206_s4] sm:$0xff]  ;;  %v248_v20 = vld [vmem:[%s206_s4 + $0x8] sm:$0xff] }
  0x52   : > { %v308_v5 = vshrl.u32 %v307_v4, 7  ;;  %v311_v14 = vand.u32 127, %v307_v4  ;;  %s496_s17 = sshll.u32 %s229_s21, 3  ;;  %vm359_vm5 = vcmask 1041408   ;;  %vm361_vm6 = vcmask 1042432   ;;  %s501_s22 = sshll.u32 %s773_s14, 7 }
  0x53   : > { %600 = vpow2.f32 %v497_v2  ;;  %vm363_vm7 = vcmask 1043456   ;;  %s231_s27 = scalar_lea.vmem [#allocation7], %s496_s17  ;;  %s380_s7 = scalar_lea.hbm %s1002_s2, %s501_s22 }
  0x54   : > { %602 = vpow2.f32 %v498_v3  ;;  %v309_v6 = vadd.s32 8, %v308_v5  ;;  %v312_v8 = vmul.u32 128, %v308_v5  ;;  %s382_s5 = sshll.u32 %s231_s27, 4  ;;  %s369_s8 = scalar_lea.sflag [#allocation4], %s229_s21  ;;  %s383_s5 = int_to_ptr.vmem [resolvable:$true] %s382_s5 }
  0x55   : > { %s676_s18 = scalar_lea.vmem %s383_s5, 128  ;;  %p1013_p4 = scmp.ne.s32.totalorder %s1007_s25, 0 }
  0x56   : > { %v313_v11 = vmul.u32 128, %v309_v6  ;;  %v315_v15 = vadd.s32 %v314_v12, %v312_v8  ;;  %p677_p2 = scmp.ne.s32.totalorder %s383_s5, %s676_s18  ;;  %s787_s20 = smov [#allocation7]  }
  0x57   : > { %s680_s23 = sshll.u32 %s787_s20, 4  ;;  %s681_s23 = int_to_ptr.vmem [resolvable:$false] %s680_s23 }
  0x58   : > { %v316_v16 = vadd.s32 %v314_v12, %v313_v11  ;;  %v937_v17 = vadd.s32 %v315_v15, %v311_v14  ;;  %p678_p12 = pnand %p677_p2, %p1013_p4  ;;  %s682_s14 = scalar_lea.vmem %s681_s23, 256 }
  0x59   : > { %p683_p0 = scmp.lt.s32.totalorder %s383_s5, %s681_s23  ;;  %p684_p8 = scmp.lt.s32.totalorder %s682_s14, %s676_s18 }
  0x5a   : > { %v939_v18 = vadd.s32 %v316_v16, %v311_v14  ;;  %vm319_vm0 = vcmp.lt.s32.totalorder %v937_v17, 2048  ;;  %p679_p13 = pneg %p678_p12 }
  0x5b   : > { %v325_v21 = vsel %vm319_vm0, %v247_v19, 0.0  ;;  %p685_p9 = por %p684_p8, %p683_p0 }
  0x5c   : > { %vm320_vm1 = vcmp.lt.s32.totalorder %v939_v18, 2048 }
  0x5d   : > { %v326_v23 = vsel %vm320_vm1, %v248_v20, 0.0  ;;  %p686_p10 = pnand %p685_p9, %p679_p13 }
  0x5e   : > { %v350_v63 = vadd.f32 %v326_v23, %v325_v21 }
  0x60   : > { %v601_v7 = vpop.eup %600 }
  0x61   : > { %v603_v9 = vpop.eup %602  ;;  %v255_v10 = vadd.f32 1.0, %v601_v7  ;;  %v351_v7 = vrot.slane %v350_v63, 4 }
  0x62   : > { %v256_v13 = vadd.f32 1.0, %v603_v9 }
  0x63   : > { %604 = vrcp.f32 %v255_v10  ;;  %v352_v14 = vadd.f32 %v351_v7, %v350_v63 }
  0x64   : > { %606 = vrcp.f32 %v256_v13 }
  0x70   : > { %v605_v22 = vpop.eup %604 }
  0x71   : > { %v607_v24 = vpop.eup %606  ;;  %v265_v25 = vsub.f32 0.0, %v605_v22  ;;  %v323_v26 = vsel %vm319_vm0, %v605_v22, 0.0  ;;  %v261_v42 = vmul.f32 %v605_v22, %v247_v19 }
  0x72   : > { %v266_v27 = vsub.f32 0.0, %v607_v24  ;;  %v324_v28 = vsel %vm320_vm1, %v607_v24, 0.0  ;;  %v334_v29 = vmul.f32 %v325_v21, %v323_v26  ;;  %v262_v45 = vmul.f32 %v607_v24, %v248_v20 }
  0x73   : > { %v267_v30 = vmul.f32 1.442695, %v265_v25  ;;  %v335_v31 = vmul.f32 %v326_v23, %v324_v28  ;;  %v343_v32 = vadd.f32 %v324_v28, %v323_v26  ;;  %v263_v49 = vsub.f32 %v605_v22, %v261_v42 }
  0x74   : > { %v269_v33 = vmul.f32 1.442695, %v266_v27  ;;  %v264_v52 = vsub.f32 %v607_v24, %v262_v45  ;;  %v353_v23 = vrot.slane %v352_v14, 2 }
  0x75   : > { %608 = vpow2.f32 %v267_v30  ;;  %v336_v34 = vadd.f32 %v335_v31, %v334_v29  ;;  %v344_v5 = vrot.slane %v343_v32, 4 }
  0x76   : > { %610 = vpow2.f32 %v269_v33  ;;  %v354_v28 = vadd.f32 %v353_v23, %v352_v14 }
  0x77   : > { %v337_v3 = vrot.slane %v336_v34, 4  ;;  %v345_v12 = vadd.f32 %v344_v5, %v343_v32 }
  0x78   : > { %v355_v17 = vrot.slane %v354_v28, 1 }
  0x79   : > { %v338_v10 = vadd.f32 %v337_v3, %v336_v34  ;;  %v346_v21 = vrot.slane %v345_v12, 2 }
  0x7b   : > { %v339_v19 = vrot.slane %v338_v10, 2  ;;  %v347_v26 = vadd.f32 %v346_v21, %v345_v12 }
  0x7d   : > { %v340_v25 = vadd.f32 %v339_v19, %v338_v10  ;;  %v348_v31 = vrot.slane %v347_v26, 1 }
  0x7f   : > { %v341_v30 = vrot.slane %v340_v25, 1  ;;  %v349_v18 = vadd.f32 %v348_v31, %v347_v26 }
  0x81   : > { %v342_v34 = vadd.f32 %v341_v30, %v340_v25 }
  0x82   : > { %v609_v35 = vpop.eup %608 }
  0x83   : > { %v611_v36 = vpop.eup %610  ;;  %v271_v37 = vadd.f32 1.0, %v609_v35  ;;  %v274_v39 = vmul.f32 -0.5, %v609_v35  ;;  %v277_v43 = vand.u32 2147483647, %v609_v35 }
  0x84   : > { %v280_v38 = vadd.f32 1.0, %v611_v36  ;;  %v283_v40 = vmul.f32 -0.5, %v611_v36  ;;  %v286_v46 = vand.u32 2147483647, %v611_v36 }
  0x85   : > { %612 = vlog2.f32 %v271_v37  ;;  %v275_v41 = vadd.f32 1.0, %v274_v39  ;;  %vm278_vm2 = vcmp.lt.f32.partialorder %v277_v43, 0.0004427343 }
  0x86   : > { %614 = vlog2.f32 %v280_v38  ;;  %v284_v44 = vadd.f32 1.0, %v283_v40  ;;  %vm287_vm3 = vcmp.lt.f32.partialorder %v286_v46, 0.0004427343 }
  0x87   : > { %v276_v47 = vmul.f32 %v609_v35, %v275_v41 }
  0x88   : > { %v285_v50 = vmul.f32 %v611_v36, %v284_v44  ;;  %v356_v36 = vadd.f32 %v355_v17, %v354_v28 }
  0x92   : > { %v613_v48 = vpop.eup %612 }
  0x93   : > { %v615_v51 = vpop.eup %614  ;;  %v273_v53 = vmul.f32 0.6931472, %v613_v48 }
  0x94   : > { %v282_v54 = vmul.f32 0.6931472, %v615_v51 }
  0x95   : > { %v279_v55 = vsel %vm278_vm2, %v276_v47, %v273_v53 }
  0x96   : > { %v288_v56 = vsel %vm287_vm3, %v285_v50, %v282_v54  ;;  %v289_v57 = vadd.f32 %v279_v55, %v263_v49 }
  0x97   : > { %v290_v58 = vadd.f32 %v288_v56, %v264_v52 }
  0x98   : > { %v291_v59 = vsub.f32 0.0, %v289_v57 }
  0x99   : > { %v292_v60 = vsub.f32 0.0, %v290_v58 }
  0x9a   : > { %v293_v61 = vmul.f32 1.442695, %v291_v59 }
  0x9b   : > { %v295_v62 = vmul.f32 1.442695, %v292_v60 }
  0x9c   : > { %616 = vpow2.f32 %v293_v61 }
  0x9d   : > { %618 = vpow2.f32 %v295_v62 }
  0xa9   : > { %v617_v0 = vpop.eup %616 }
  0xaa   : > { %v619_v1 = vpop.eup %618  ;;  %v297_v2 = vsub.f32 1.0, %v617_v0 }
  0xab   : > { %v298_v4 = vsub.f32 1.0, %v619_v1 }
  0xac   : > { %v299_v6 = vmul.f32 %v297_v2, %v297_v2 }
  0xad   : > { %v300_v8 = vmul.f32 %v298_v4, %v298_v4 }
  0xae   : > { %v301_v9 = vmul.f32 0.25, %v299_v6 }
  0xaf   : > { %v302_v11 = vmul.f32 0.25, %v300_v8 }
  0xb0   : > { %v303_v13 = vmul.f32 %v301_v9, %v289_v57 }
  0xb1   : > { %v304_v15 = vmul.f32 %v302_v11, %v290_v58 }
  0xb2   : > { %v321_v16 = vsel %vm319_vm0, %v303_v13, 0.0 }
  0xb3   : > { %v322_v20 = vsel %vm320_vm1, %v304_v15, 0.0 }
  0xb4   : > { %v327_v22 = vadd.f32 %v322_v20, %v321_v16 }
  0xb6   : > { %v328_v24 = vrot.slane %v327_v22, 4 }
  0xb8   : > { %v329_v27 = vadd.f32 %v328_v24, %v327_v22 }
  0xba   : > { %v330_v29 = vrot.slane %v329_v27, 2 }
  0xbc   : > { %v331_v32 = vadd.f32 %v330_v29, %v329_v27 }
  0xbe   : > { %v332_v33 = vrot.slane %v331_v32, 1 }
  0xc0   : > { %v333_v35 = vadd.f32 %v332_v33, %v331_v32 }
  0xc2   : > { %v358_v37 = vsel %vm357_vm4, %v333_v35, %v342_v34 }
  0xc3   : > { %v360_v38 = vsel %vm359_vm5, %v358_v37, %v349_v18 }
  0xc4   : > { %v362_v39 = vsel %vm361_vm6, %v360_v38, %v356_v36 }
  0xc5   : > { %v364_v40 = vsel %vm363_vm7, %v362_v39, 0.0 }
  0xc6   : > { %367 = vst [vmem:[%s231_s27] sm:$0xff] %v364_v40 }
  0xc7   : > { %689 = shalt.err (!%p686_p10)
}
  0xc8   : > { %s690_s30 = scalar_lea.hbm %s380_s7, 128  ;;  %s694_s4 = scalar_lea.hbm %s1002_s2, 256 }
  0xc9   : > { %p691_p11 = scmp.ne.s32.totalorder %s380_s7, %s690_s30  ;;  %p695_p7 = scmp.lt.s32.totalorder %s380_s7, %s1002_s2 }
  0xca   : > { %p696_p6 = scmp.lt.s32.totalorder %s694_s4, %s690_s30 }
  0xcb   : > { %p692_p1 = pnand %p691_p11, %p1013_p4 }
  0xcc   : > { %p697_p5 = por %p696_p6, %p695_p7 }
  0xcd   : > { %p693_p3 = pneg %p692_p1 }
  0xcf   : > { %p698_p2 = pnand %p697_p5, %p693_p3 }
  0xd1   : > { %701 = shalt.err (!%p698_p2)
}
  0xd2   : > { %510 = dma.vmem_to_hbm [thread:$0]  (%p1013_p4), %s383_s5, 128, %s380_s7, %s369_s8  }
  0xd3 PF: > { %s394_s17 = sand.u32 1, %s753_s9   ;;  %p1014_p12 = scmp.ne.s32.totalorder %s1008_s26, 0 }
  0xd4   : > { %p1015_p13 = scmp.ge.s32.totalorder %s781_s16, 2  ;;  %s395_s22 = scalar_lea.sflag [#allocation4], %s394_s17 }
  0xd6   : > { %p520_p0 = pnand %p1015_p13, %p1014_p12 }
  0xd8   : > { %p521_p8 = pneg %p520_p0 }
  0xda   : > { %747 = dma.done.wait (%p521_p8), %s395_s22, 128  }
  0xdb   : > { %749 = vsyncadd (%p521_p8), %s395_s22, 4294967168  ;;  %s21_s16 = sadd.s32 1, %s781_s16   ;;  %s1016_s9 = smov %s757_s10 }
  0xdc   : > { %p18_p9 = scmp.ge.s32.totalorder %s21_s16, 4   ;;  %s1017_s10 = smov %s761_s11 }
  0xdd   : > { %s1018_s11 = smov %s861_s24  ;;  %s1019_s12 = smov %s769_s13 }
  0xde   : > { %s990_s13 = smov 0   ;;  %s1020_s14 = smov %s777_s15 }
  0xdf   : > { %s1021_s15 = smov %s1023_s19  ;;  %20 = sbr.rel (!%p18_p9) target bundleno = 9 (0x9), region = 90 }
  0xe4   :  { %400 = vsyncpa [#allocation3], 1 }
  0xe5   :  { %402 = vsyncpa [#allocation3 + $0x1], 1 }
  0xe6   :  { %403 = vsyncpa [#allocation6], 1 }
  0xe7   :  { %405 = vsyncpa [#allocation6 + $0x1], 1 }
  0xe8   :  { %406 = vsyncpa [#allocation4], 1 }
  0xe9   :  { %408 = vsyncpa [#allocation4 + $0x1], 1 }

</bundles_post_ra>
